<compile_context>
chip_gen: v6e
topology: v6e:2x2x1
jax: 0.10.0
libtpu: 0.0.40
codegen_flags: <defaults>
</compile_context>

<pallas_src>
import functools

import jax
import jax.numpy as jnp
from jax import lax
from jax.experimental import pallas as pl
from jax.experimental.pallas import tpu as pltpu


def _self_attn_kernel(x_full_ref, x_tile_ref, wq_ref, bq_ref, wvk_ref, bvk_ref,
                      gamma_ref, out_ref, attn_ref=None):
    # x_full_ref: (1, C, N)  -- all spatial positions of this batch element
    # x_tile_ref: (1, C, TQ) -- query-tile columns of the same tensor
    x_full = x_full_ref[0]                     # (C, N)
    x_tile = x_tile_ref[0]                     # (C, TQ)
    c = x_full.shape[0]

    # Query projection for this tile only: (C8, TQ).
    q_t = (jnp.dot(wq_ref[...], x_tile, preferred_element_type=jnp.float32)
           + bq_ref[...])

    # Fused value+key projection over all positions: (C + C8, N).
    # Value rows come first so both slices start on sublane-aligned offsets.
    vk_t = (jnp.dot(wvk_ref[...], x_full, preferred_element_type=jnp.float32)
            + bvk_ref[...])
    v_t = vk_t[:c]                             # (C,  N)
    k_t = vk_t[c:]                             # (C8, N)

    # energy[m, n] = <q_m, k_n>: contract the channel axis of both operands
    # directly -- no transposed copy of k is ever materialized.
    energy = lax.dot_general(q_t, k_t, (((0,), (0,)), ((), ())),
                             preferred_element_type=jnp.float32)   # (TQ, N)

    # Numerically stable row softmax; reciprocal on the EUP approx path.
    m = jnp.max(energy, axis=-1, keepdims=True)
    e = jnp.exp(energy - m)
    denom = jnp.sum(e, axis=-1, keepdims=True)
    attn = e * pl.reciprocal(denom, approx=True)                   # (TQ, N)

    # out[c, m] = sum_n v[c, n] * attn[m, n]: contract the last axes of both
    # operands -- no transposed copy of attn is materialized either.
    out_cn = lax.dot_general(v_t, attn, (((1,), (1,)), ((), ())),
                             preferred_element_type=jnp.float32)   # (C, TQ)

    gamma = gamma_ref[0, 0]
    out_ref[0] = gamma * out_cn + x_tile
    if attn_ref is not None:
        attn_ref[0] = attn


@functools.partial(jax.jit, static_argnames=("return_attention",))
def self_attn_forward(x_nchw, wq, bq, wk, bk, wv, bv, gamma,
                      return_attention=True):
    """SAGAN self-attention forward.

    x_nchw : (B, C, W, H) float32
    wq, wk : (C//8, C)  (PyTorch 1x1 conv weight with trailing 1x1 squeezed)
    wv     : (C, C)
    bq, bk : (C//8,);  bv: (C,)
    gamma  : (1, 1) scalar parameter
    """
    B, C, W, H = x_nchw.shape
    N = W * H
    C8 = wq.shape[0]

    # NCHW -> (B, C, N): reshape only -- no transpose, no extra HBM traffic.
    x_flat = x_nchw.reshape(B, C, N).astype(jnp.float32)

    # Fuse value + key projections into one matmul. Value rows first so the
    # in-kernel slices land on sublane-aligned offsets when C % 8 == 0.
    w_vk = jnp.concatenate([wv, wk], axis=0).astype(jnp.float32)            # (C+C8, C)
    b_vk = jnp.concatenate([bv, bk], axis=0).reshape(C + C8, 1).astype(jnp.float32)
    wq2 = wq.astype(jnp.float32)
    bq2 = bq.reshape(C8, 1).astype(jnp.float32)
    gamma2 = gamma.reshape(1, 1).astype(jnp.float32)

    # Query-tile size: 128 lanes when N allows it, else the whole row.
    TQ = 128 if N % 128 == 0 else N
    grid = (B, N // TQ)

    in_specs = [
        pl.BlockSpec((1, C, N), lambda b, j: (b, 0, 0)),      # x (all positions)
        pl.BlockSpec((1, C, TQ), lambda b, j: (b, 0, j)),     # x (query tile)
        pl.BlockSpec((C8, C), lambda b, j: (0, 0)),           # wq
        pl.BlockSpec((C8, 1), lambda b, j: (0, 0)),           # bq
        pl.BlockSpec((C + C8, C), lambda b, j: (0, 0)),       # w_vk (fused)
        pl.BlockSpec((C + C8, 1), lambda b, j: (0, 0)),       # b_vk (fused)
        pl.BlockSpec(memory_space=pltpu.SMEM),                # gamma scalar
    ]
    out_spec_out = pl.BlockSpec((1, C, TQ), lambda b, j: (b, 0, j))
    if return_attention:
        out_shape = (jax.ShapeDtypeStruct((B, C, N), jnp.float32),
                     jax.ShapeDtypeStruct((B, N, N), jnp.float32))
        out_specs = [out_spec_out,
                     pl.BlockSpec((1, TQ, N), lambda b, j: (b, j, 0))]
    else:
        out_shape = jax.ShapeDtypeStruct((B, C, N), jnp.float32)
        out_specs = out_spec_out

    result = pl.pallas_call(
        _self_attn_kernel,
        out_shape=out_shape,
        grid_spec=pltpu.PrefetchScalarGridSpec(
            num_scalar_prefetch=0,
            grid=grid,
            in_specs=in_specs,
            out_specs=out_specs,
        ),
        compiler_params=pltpu.CompilerParams(
            dimension_semantics=("parallel", "parallel")),
    )(x_flat, x_flat, wq2, bq2, w_vk, b_vk, gamma2)

    # TODO(synk): optional bf16 cast of q/k/attn/v before the MXU dots would
    # help v5e throughput but loosens numerics; kept f32 here.

    if return_attention:
        out_flat, attn = result
        return out_flat.reshape(B, C, W, H), attn
    return result.reshape(B, C, W, H)


def reference_forward(x_nchw, wq, bq, wk, bk, wv, bv, gamma):
    """Pure-JAX reference mirroring the PyTorch forward exactly."""
    B, C, W, H = x_nchw.shape
    N = W * H
    x_flat = x_nchw.reshape(B, C, N)                                   # (B, C, N)
    q = jnp.einsum("oc,bcn->bon", wq, x_flat) + bq.reshape(1, -1, 1)   # (B, C8, N)
    k = jnp.einsum("oc,bcn->bon", wk, x_flat) + bk.reshape(1, -1, 1)   # (B, C8, N)
    v = jnp.einsum("oc,bcn->bon", wv, x_flat) + bv.reshape(1, -1, 1)   # (B, C,  N)
    proj_query = jnp.transpose(q, (0, 2, 1))                           # (B, N, C8)
    energy = jnp.einsum("bnc,bcm->bnm", proj_query, k)                 # (B, N, N)
    attention = jax.nn.softmax(energy, axis=-1)
    out = jnp.einsum("bcn,bmn->bcm", v, attention)                     # bmm(V, attn^T)
    out = out.reshape(B, C, W, H)
    out = gamma.reshape(()) * out + x_nchw
    return out, attention


if __name__ == "__main__":
    B, C, W, H = 2, 16, 16, 16      # in_dim = 16 -> in_dim // 8 = 2
    C8 = C // 8

    key = jax.random.PRNGKey(0)
    kx, kwq, kbq, kwk, kbk, kwv, kbv = jax.random.split(key, 7)

    x = jax.random.normal(kx, (B, C, W, H), dtype=jnp.float32)

    # PyTorch-style parameters: conv weights (out, in), biases (out,).
    scale = 1.0 / jnp.sqrt(jnp.float32(C))
    wq = jax.random.normal(kwq, (C8, C), dtype=jnp.float32) * scale
    bq = jax.random.normal(kbq, (C8,), dtype=jnp.float32) * scale
    wk = jax.random.normal(kwk, (C8, C), dtype=jnp.float32) * scale
    bk = jax.random.normal(kbk, (C8,), dtype=jnp.float32) * scale
    wv = jax.random.normal(kwv, (C, C), dtype=jnp.float32) * scale
    bv = jax.random.normal(kbv, (C,), dtype=jnp.float32) * scale
    # Module inits gamma to 0; use a nonzero value so the test exercises the
    # value path and the residual scaling.
    gamma = jnp.full((1, 1), 0.5, dtype=jnp.float32)

    out, attn = self_attn_forward(x, wq, bq, wk, bk, wv, bv, gamma)
    out = jax.block_until_ready(out)
    attn = jax.block_until_ready(attn)

    # Attention-free (bandwidth-saving) variant.
    out_only = self_attn_forward(x, wq, bq, wk, bk, wv, bv, gamma,
                                 return_attention=False)
    out_only = jax.block_until_ready(out_only)

    out_ref, attn_ref = reference_forward(x, wq, bq, wk, bk, wv, bv, gamma)
    assert out.shape == (B, C, W, H) and attn.shape == (B, W * H, W * H)
    # approx=True reciprocal slightly loosens numerics vs the exact softmax.
    assert jnp.allclose(out, out_ref, atol=1e-2, rtol=1e-2)
    assert jnp.allclose(attn, attn_ref, atol=1e-3, rtol=1e-2)
    assert jnp.allclose(out_only, out_ref, atol=1e-2, rtol=1e-2)

    print("KERNEL_OK")
</pallas_src>

<mosaic_0001>
module attributes {stable_mosaic.version = 11 : i64} {
  func.func @_self_attn_kernel(%arg0: i32, %arg1: i32, %arg2: memref<1x16x256xf32, #tpu.memory_space<vmem>>, %arg3: memref<1x16x128xf32, #tpu.memory_space<vmem>>, %arg4: memref<2x16xf32, #tpu.memory_space<vmem>>, %arg5: memref<2x1xf32, #tpu.memory_space<vmem>>, %arg6: memref<18x16xf32, #tpu.memory_space<vmem>>, %arg7: memref<18x1xf32, #tpu.memory_space<vmem>>, %arg8: memref<1x1xf32, #tpu.memory_space<smem>>, %arg9: memref<1x16x128xf32, #tpu.memory_space<vmem>>, %arg10: memref<1x128x256xf32, #tpu.memory_space<vmem>>) attributes {dimension_semantics = [#tpu.dimension_semantics<parallel>, #tpu.dimension_semantics<parallel>], iteration_bounds = array<i64: 2, 2>, scalar_prefetch = 0 : i64, scratch_operands = 0 : i64, tpu.core_type = #tpu.core_type<tc>, window_params = [{transform_indices = @transform_0, window_bounds = array<i64: 1, 16, 256>}, {transform_indices = @transform_1, window_bounds = array<i64: 1, 16, 128>}, {pipeline_mode = #tpu.pipeline_mode<synchronous>, transform_indices = @transform_2, window_bounds = array<i64: 2, 16>}, {pipeline_mode = #tpu.pipeline_mode<synchronous>, transform_indices = @transform_3, window_bounds = array<i64: 2, 1>}, {pipeline_mode = #tpu.pipeline_mode<synchronous>, transform_indices = @transform_4, window_bounds = array<i64: 18, 16>}, {pipeline_mode = #tpu.pipeline_mode<synchronous>, transform_indices = @transform_5, window_bounds = array<i64: 18, 1>}, {transform_indices = @transform_6, window_bounds = array<i64: 1, 1>}, {transform_indices = @transform_7, window_bounds = array<i64: 1, 16, 128>}, {transform_indices = @transform_8, window_bounds = array<i64: 1, 128, 256>}]} {
    %c0 = arith.constant 0 : index
    %c0_0 = arith.constant 0 : index
    %c0_1 = arith.constant 0 : index
    %0 = vector.load %arg2[%c0, %c0_0, %c0_1] : memref<1x16x256xf32, #tpu.memory_space<vmem>>, vector<1x16x256xf32>
    %1 = vector.shape_cast %0 : vector<1x16x256xf32> to vector<16x256xf32>
    %c0_2 = arith.constant 0 : index
    %c0_3 = arith.constant 0 : index
    %c0_4 = arith.constant 0 : index
    %2 = vector.load %arg3[%c0_2, %c0_3, %c0_4] : memref<1x16x128xf32, #tpu.memory_space<vmem>>, vector<1x16x128xf32>
    %3 = vector.shape_cast %2 : vector<1x16x128xf32> to vector<16x128xf32>
    %c0_5 = arith.constant 0 : index
    %c0_6 = arith.constant 0 : index
    %4 = vector.load %arg4[%c0_5, %c0_6] : memref<2x16xf32, #tpu.memory_space<vmem>>, vector<2x16xf32>
    %cst = arith.constant dense<0.000000e+00> : vector<2x128xf32>
    %5 = tpu.matmul %4, %3, %cst {dimension_numbers = #tpu.dot_dimension_numbers<[1], [0], [0], [1], [0, 0, 1, 1], [], []>} : vector<2x16xf32>, vector<16x128xf32>, vector<2x128xf32> -> vector<2x128xf32>
    %c0_7 = arith.constant 0 : index
    %c0_8 = arith.constant 0 : index
    %6 = vector.load %arg5[%c0_7, %c0_8] : memref<2x1xf32, #tpu.memory_space<vmem>>, vector<2x1xf32>
    %7 = vector.broadcast %6 : vector<2x1xf32> to vector<2x128xf32>
    %8 = arith.addf %5, %7 : vector<2x128xf32>
    %c0_9 = arith.constant 0 : index
    %c0_10 = arith.constant 0 : index
    %9 = vector.load %arg6[%c0_9, %c0_10] : memref<18x16xf32, #tpu.memory_space<vmem>>, vector<18x16xf32>
    %cst_11 = arith.constant dense<0.000000e+00> : vector<18x256xf32>
    %10 = tpu.matmul %9, %1, %cst_11 {dimension_numbers = #tpu.dot_dimension_numbers<[1], [0], [0], [1], [0, 0, 1, 1], [], []>} : vector<18x16xf32>, vector<16x256xf32>, vector<18x256xf32> -> vector<18x256xf32>
    %c0_12 = arith.constant 0 : index
    %c0_13 = arith.constant 0 : index
    %11 = vector.load %arg7[%c0_12, %c0_13] : memref<18x1xf32, #tpu.memory_space<vmem>>, vector<18x1xf32>
    %12 = vector.broadcast %11 : vector<18x1xf32> to vector<18x256xf32>
    %13 = arith.addf %10, %12 : vector<18x256xf32>
    %14 = vector.extract_strided_slice %13 {offsets = [0, 0], sizes = [16, 256], strides = [1, 1]} : vector<18x256xf32> to vector<16x256xf32>
    %15 = vector.extract_strided_slice %13 {offsets = [16, 0], sizes = [2, 256], strides = [1, 1]} : vector<18x256xf32> to vector<2x256xf32>
    %cst_14 = arith.constant dense<0.000000e+00> : vector<128x256xf32>
    %16 = tpu.matmul %8, %15, %cst_14 {dimension_numbers = #tpu.dot_dimension_numbers<[0], [0], [1], [1], [0, 1, 1, 1], [], []>} : vector<2x128xf32>, vector<2x256xf32>, vector<128x256xf32> -> vector<128x256xf32>
    %cst_15 = arith.constant dense<0xFF800000> : vector<128xf32>
    %17 = vector.multi_reduction <maximumf>, %16, %cst_15 [1] : vector<128x256xf32> to vector<128xf32>
    %18 = vector.shape_cast %17 : vector<128xf32> to vector<128x1xf32>
    %19 = vector.broadcast %18 : vector<128x1xf32> to vector<128x256xf32>
    %20 = arith.subf %16, %19 : vector<128x256xf32>
    %21 = math.exp %20 : vector<128x256xf32>
    %cst_16 = arith.constant dense<0.000000e+00> : vector<128xf32>
    %22 = vector.multi_reduction <add>, %21, %cst_16 [1] : vector<128x256xf32> to vector<128xf32>
    %23 = vector.shape_cast %22 : vector<128xf32> to vector<128x1xf32>
    %24 = tpu.reciprocal %23 {approx = true} : vector<128x1xf32> -> vector<128x1xf32>
    %25 = vector.broadcast %24 : vector<128x1xf32> to vector<128x256xf32>
    %26 = arith.mulf %21, %25 : vector<128x256xf32>
    %cst_17 = arith.constant dense<0.000000e+00> : vector<16x128xf32>
    %27 = tpu.matmul %14, %26, %cst_17 {dimension_numbers = #tpu.dot_dimension_numbers<[1], [1], [0], [0], [0, 0, 1, 0], [], []>} : vector<16x256xf32>, vector<128x256xf32>, vector<16x128xf32> -> vector<16x128xf32>
    %c0_18 = arith.constant 0 : index
    %c0_19 = arith.constant 0 : index
    %28 = memref.load %arg8[%c0_18, %c0_19] : memref<1x1xf32, #tpu.memory_space<smem>>
    %29 = vector.broadcast %28 : f32 to vector<16x128xf32>
    %30 = arith.mulf %29, %27 : vector<16x128xf32>
    %31 = arith.addf %30, %3 : vector<16x128xf32>
    %c0_20 = arith.constant 0 : index
    %c0_21 = arith.constant 0 : index
    %c0_22 = arith.constant 0 : index
    %32 = vector.load %arg9[%c0_20, %c0_21, %c0_22] : memref<1x16x128xf32, #tpu.memory_space<vmem>>, vector<1x16x128xf32>
    %33 = vector.shape_cast %32 : vector<1x16x128xf32> to vector<16x128xf32>
    %34 = vector.shape_cast %31 : vector<16x128xf32> to vector<1x16x128xf32>
    tpu.vector_store %arg9[%c0_20, %c0_21, %c0_22], %34 {strides = array<i32>} : memref<1x16x128xf32, #tpu.memory_space<vmem>>, vector<1x16x128xf32>,
    %c0_23 = arith.constant 0 : index
    %c0_24 = arith.constant 0 : index
    %c0_25 = arith.constant 0 : index
    %35 = vector.load %arg10[%c0_23, %c0_24, %c0_25] : memref<1x128x256xf32, #tpu.memory_space<vmem>>, vector<1x128x256xf32>
    %36 = vector.shape_cast %35 : vector<1x128x256xf32> to vector<128x256xf32>
    %37 = vector.shape_cast %26 : vector<128x256xf32> to vector<1x128x256xf32>
    tpu.vector_store %arg10[%c0_23, %c0_24, %c0_25], %37 {strides = array<i32>} : memref<1x128x256xf32, #tpu.memory_space<vmem>>, vector<1x128x256xf32>,
    return
  }
  func.func @transform_0(%arg0: i32, %arg1: i32) -> (i32, i32, i32) {
    %c0_i32 = arith.constant 0 : i32
    %c0_i32_0 = arith.constant 0 : i32
    %c0_i32_1 = arith.constant 0 : i32
    return %arg0, %c0_i32, %c0_i32_0 : i32, i32, i32
  }
  func.func @transform_1(%arg0: i32, %arg1: i32) -> (i32, i32, i32) {
    %c0_i32 = arith.constant 0 : i32
    %c0_i32_0 = arith.constant 0 : i32
    return %arg0, %c0_i32, %arg1 : i32, i32, i32
  }
  func.func @transform_2(%arg0: i32, %arg1: i32) -> (i32, i32) {
    %c0_i32 = arith.constant 0 : i32
    %c0_i32_0 = arith.constant 0 : i32
    %c0_i32_1 = arith.constant 0 : i32
    return %c0_i32, %c0_i32_0 : i32, i32
  }
  func.func @transform_3(%arg0: i32, %arg1: i32) -> (i32, i32) {
    %c0_i32 = arith.constant 0 : i32
    %c0_i32_0 = arith.constant 0 : i32
    %c0_i32_1 = arith.constant 0 : i32
    return %c0_i32, %c0_i32_0 : i32, i32
  }
  func.func @transform_4(%arg0: i32, %arg1: i32) -> (i32, i32) {
    %c0_i32 = arith.constant 0 : i32
    %c0_i32_0 = arith.constant 0 : i32
    %c0_i32_1 = arith.constant 0 : i32
    return %c0_i32, %c0_i32_0 : i32, i32
  }
  func.func @transform_5(%arg0: i32, %arg1: i32) -> (i32, i32) {
    %c0_i32 = arith.constant 0 : i32
    %c0_i32_0 = arith.constant 0 : i32
    %c0_i32_1 = arith.constant 0 : i32
    return %c0_i32, %c0_i32_0 : i32, i32
  }
  func.func @transform_6(%arg0: i32, %arg1: i32) -> (i32, i32) {
    %c0_i32 = arith.constant 0 : i32
    %c0_i32_0 = arith.constant 0 : i32
    %c0_i32_1 = arith.constant 0 : i32
    return %c0_i32, %c0_i32_0 : i32, i32
  }
  func.func @transform_7(%arg0: i32, %arg1: i32) -> (i32, i32, i32) {
    %c0_i32 = arith.constant 0 : i32
    %c0_i32_0 = arith.constant 0 : i32
    return %arg0, %c0_i32, %arg1 : i32, i32, i32
  }
  func.func @transform_8(%arg0: i32, %arg1: i32) -> (i32, i32, i32) {
    %c0_i32 = arith.constant 0 : i32
    %c0_i32_0 = arith.constant 0 : i32
    return %arg0, %arg1, %c0_i32 : i32, i32, i32
  }
}

</mosaic_0001>

<bundles_post_ra>
// kernel: self_attn_forward.1
= control target key start
LH: loop header
LB: loop body
LE: loop exit
PB: predicated region body
PF: predicated region fallthrough
CT: control target
= control target key end

     0   :  { %s2281_s0 = inlined_call_operand.vmem [shape: f32[2,16,256], index: 0, kind: input, shape index: {}, may-alias: {0,1}]   ;;  %s2282_s1 = inlined_call_operand.vmem [shape: f32[2,16,256], index: 1, kind: input, shape index: {}, may-alias: {0,1}]   ;;  %s2283_s2 = inlined_call_operand.vmem [shape: f32[2,16], index: 2, kind: input, shape index: {}]   ;;  %s2284_s3 = inlined_call_operand.vmem [shape: f32[2,1], index: 3, kind: input, shape index: {}]   ;;  %s2285_s4 = inlined_call_operand.vmem [shape: f32[18,16], index: 4, kind: input, shape index: {}]   ;;  %s2286_s5 = inlined_call_operand.vmem [shape: f32[18,1], index: 5, kind: input, shape index: {}]   ;;  %s2287_s6 = inlined_call_operand.<no memory space> [shape: f32[1,1], index: 6, kind: input, shape index: {}]   ;;  %s2288_s7 = inlined_call_operand.vmem [shape: f32[2,16,256], index: 7, kind: output, shape index: {0}]   ;;  %s2289_s8 = inlined_call_operand.hbm [shape: f32[2,256,256], index: 8, kind: output, shape index: {1}]  }
   0x1   :  { %2291 = sst [smem:[#allocation9_spill]] %s2281_s0 }
   0x2   :  { %2292 = sst [smem:[#allocation10_spill]] %s2282_s1 }
   0x3   :  { %2293 = sst [smem:[#allocation11_spill]] %s2283_s2 }
   0x4   :  { %14 = sst [smem:[#allocation2]] %s2287_s6 }
   0x5   :  { %15 = vsyncpa [#allocation6], 0 }
   0x6   :  { %17 = vsyncpa [#allocation6 + $0x1], 0  ;;  %s1766_s29 = smov 0   ;;  %s1768_s30 = smov 0  }
   0x7   :  { %s1770_s9 = smov 0   ;;  %s1772_s10 = smov 0  }
   0x8   :  { %s1774_s11 = smov 0   ;;  %s1776_s12 = smov 0  }
   0x9   :  { %s1778_s13 = smov 0   ;;  %s1780_s14 = smov 0  }
   0xa LB: > { %s1387_s6 = sadd.s32 4294967295, %s1710_s14   ;;  %s1388_s15 = sadd.s32 4294967294, %s1710_s14   ;;  %s1710_s14 = sphi %s1780_s14, %s23_s14   ;;  %s1706_s13 = sphi %s1778_s13, %s2309_s13   ;;  %s1702_s12 = sphi %s1776_s12, %s2308_s12   ;;  %s1698_s11 = sphi %s1774_s11, %s2307_s11   ;;  %s1694_s10 = sphi %s1772_s10, %s2306_s10   ;;  %s1690_s9 = sphi %s1770_s9, %s2305_s9   ;;  %s1686_s30 = sphi %s1768_s30, %s2304_s30   ;;  %s1682_s29 = sphi %s1766_s29, %s2303_s29  }
   0xb   : > { %s32_s16 = sadd.s32 1, %s1702_s12  ;;  %s35_s17 = sadd.s32 1, %s1706_s13 }
   0xc   : > { %p33_p0 = scmp.ge.s32.totalorder %s32_s16, 2  ;;  %p77_p1 = scmp.ne.s32.totalorder %s1690_s9, %s1686_s30 }
   0xd   : > { %p78_p2 = scmp.eq.s32.totalorder %s1710_s14, 0  ;;  %p214_p5 = scmp.eq.s32.totalorder %s1387_s6, 3 }
   0xe   : > { %s2311_s16 = smov (%p33_p0, %s32_s16), 0  ;;  %s2313_s17 = smov (!%p33_p0, %s35_s17), %s1706_s13 }
   0xf   : > { %s66_s18 = ssub.s32 %s1702_s12, %s2311_s16  ;;  %p1818_p3 = por %p78_p2, %p77_p1 }
  0x10   : > { %p37_p4 = scmp.ge.s32.totalorder %s2313_s17, 2  ;;  %p247_p6 = scmp.ne.s32.totalorder %s1686_s30, %s1682_s29 }
  0x11   : > { %p248_p7 = scmp.eq.s32.totalorder %s1388_s15, 3  ;;  %p1826_p8 = por %p214_p5, %p77_p1 }
  0x12   : > { %s2315_s17 = smov (%p37_p4, %s2313_s17), 0  ;;  %s70_s24 = sadd.s32 1, %s1690_s9 }
  0x13   : > { %2295 = sst [smem:[#allocation8_spill]] %s2315_s17  ;;  %p1830_p9 = por %p248_p7, %p247_p6 }
  0x14   : > { %s65_s22 = ssub.s32 %s1706_s13, %s2315_s17  ;;  %p1390_p11 = scmp.ge.s32.totalorder %s1710_s14, 4 }
  0x15   : > { %s67_s23 = sor.u32 %s66_s18, %s65_s22 }
  0x16   : > { %p68_p10 = scmp.eq.s32.totalorder %s67_s23, 0  ;;  %279 = sbr.rel (%p1390_p11) target bundleno = 38 (0x26), region = 36 }
  0x18   : > { %s1838_s25 = scalar_select %p68_p10, %s1690_s9, %s70_s24  }
  0x1b   : > { %290 = sbr.rel (!%p1818_p3) target bundleno = 38 (0x26), region = 44  ;;  %s292_s26 = sand.u32 (%p1818_p3), 1, %s1690_s9  }
  0x1c   : > { %s1392_s27 = sshll.u32 (%p1818_p3), %s1706_s13, 2  ;;  %s1391_s28 = sshll.u32 (%p1818_p3), %s292_s26, 4 }
  0x1d   : > { %s296_s6 = sadd.s32 (%p1818_p3), %s1702_s12, %s1392_s27  ;;  %s2298_s1 = sld [smem:[#allocation10_spill]] (%p1818_p3) }
  0x1e   : > { %s1393_s15 = sshll.u32 (%p1818_p3), %s296_s6, 3  ;;  %s294_s23 = scalar_lea.vmem (%p1818_p3), [#allocation3], %s1391_s28 }
  0x23   : > { %s298_s22 = scalar_lea.vmem %s2298_s1, %s1393_s15 }
  0x24   : > { %v329_v0 = vld [vmem:[%s298_s22] sm:$0xff]  ;;  %v331_v1 = vld [vmem:[%s298_s22 + $0x10] sm:$0xff] }
  0x25   : > { %330 = vst [vmem:[%s294_s23] sm:$0xff] %v329_v0  ;;  %332 = vst [vmem:[%s294_s23 + $0x8] sm:$0xff] %v331_v1 }
  0x26 PF: > { %p1394_p12 = scmp.ge.s32.totalorder %s1710_s14, 1  ;;  %p337_p13 = scmp.lt.s32.totalorder %s1710_s14, 5 }
  0x28   : > { %p338_p0 = pnand %p1394_p12, %p337_p13 }
  0x29   : > { %s1852_s19 = sand.u32 (!%p338_p0), 1, %s1686_s30   ;;  %s2299_s2 = sld [smem:[#allocation11_spill]] (!%p338_p0) }
  0x2a   : > { %341 = sbr.rel (%p338_p0) target bundleno = 1245 (0x4dd), region = 82  ;;  %s1395_s17 = sshll.u32 (!%p338_p0), %s1852_s19, 4 }
  0x2b   : > { %s346_s27 = scalar_lea.vmem (!%p338_p0), [#allocation3], %s1395_s17  ;;  %p386_p1 = scmp.lt.s32.totalorder (!%p338_p0), %s1698_s11, 1 }
  0x2c   : > { %s2300_s0 = sld [smem:[#allocation9_spill]] (!%p338_p0)  ;;  %s1397_s6 = sshll.u32 (!%p338_p0), %s1852_s19, 8 }
  0x2d   : > { %s2141_s15 = scalar_lea.vmem (!%p338_p0), [#allocation5], %s1397_s6  ;;  %s1156_s18 = sld [smem:[#allocation2]] (!%p338_p0) }
  0x2f   : > { %v1712_v2 = vmov 0.0   ;;  %vm1713_vm0 = vmmov 0   ;;  %v399_v3 = vld [vmem:[%s2284_s3] sm:$0x3]  ;;  %v1863_v4 = vld [vmem:[%s346_s27 + $0x8] sm:$0xff]  ;;  %v1714_v6 = vmov 0  }
  0x30   : > { %1437 = vmatprep.subr.mxu0 %v1712_v2  ;;  %1441 = vmatprep.mubr.msk.f32.mxu0 %vm1713_vm0, %v1712_v2  ;;  %v1865_v5 = vld [vmem:[%s346_s27] sm:$0xff]  ;;  %vm405_vm1 = vcmask 130048   ;;  %s387_s22 = scalar_select %p386_p1, %s1698_s11, 1  ;;  %v480_v14 = vld [vmem:[%s2285_s4 + $0x8] sm:$0xff]  ;;  %vm673_vm2 = vcmask 1041408   ;;  %vm624_vm3 = vcmask 15360  }
  0x31   : > { %573 = vmatprep.mubr.f32.mxu1 %v1712_v2  ;;  %1520 = vset.pattern.permute.xlu0 %v1714_v6  ;;  %v398_v7 = vld [vmem:[%s2299_s2] sm:$0x3]  ;;  %v484_v8 = vld [vmem:[%s2286_s5 + $0x10] sm:$0x3]  ;;  %s1424_s24 = sshll.u32 (%p1826_p8), %s1698_s11, 2 }
  0x32   : > { %1438 = vmatpush3.msra.mxu0 %v1863_v4  ;;  %402 = vperm.xlu0 %1520, %v399_v3   ;;  %s1432_s23 = sshll.u32 %s387_s22, 5  ;;  %v479_v13 = vld [vmem:[%s2285_s4] sm:$0xff]  ;;  %v481_v15 = vld [vmem:[%s2285_s4 + $0x10] sm:$0x3]  ;;  %s378_s22 = scalar_lea.vmem [#allocation4], %s1395_s17 }
  0x33   : > { %1439 = vmatprep.subr.mxu0 %v1712_v2  ;;  %s390_s27 = scalar_lea.vmem %s2300_s0, %s1432_s23  ;;  %s1209_s26 = sadd.s32 (%p1826_p8), %s1694_s10, %s1424_s24 }
  0x34   : > { %1440 = vmatpush3.msra.mxu0 %v1865_v5  ;;  %v395_v9 = vld [vmem:[%s390_s27 + $0x18] sm:$0xff]  ;;  %v394_v10 = vld [vmem:[%s390_s27 + $0x10] sm:$0xff]  ;;  %v393_v11 = vld [vmem:[%s390_s27 + $0x8] sm:$0xff] }
  0x35   : > { %1442 = vmatmul.mubr.msk.f32.vlgmr.msra.gmra.mxu0 %vm405_vm1, %v398_v7  ;;  %537 = vmatprep.subr.mxu1 %v395_v9  ;;  %v392_v12 = vld [vmem:[%s390_s27] sm:$0xff]  ;;  %s1425_s27 = sshll.u32 (%p1826_p8), %s1209_s26, 3 }
  0x36   : > { %497 = vperm.xlu0 %1520, %v484_v8   ;;  %744 = vmatprep.mubr.f32.mxu0 %v1712_v2  ;;  %s1211_s17 = scalar_lea.vmem (%p1826_p8), %s2288_s7, %s1425_s27 }
  0x37   : > { %538 = vmatpush1.msra.mxu1 %v394_v10 }
  0x38   : > { %539 = vmatprep.subr.mxu1 %v393_v11 }
  0x39   : > { %540 = vmatpush1.msra.mxu1 %v392_v12 }
  0x3a   : > { %1401 = vmatmul.mubr.msk.f32.vlgmr.msra.gmra.mxu1 %vm405_vm1, %v479_v13 }
  0x3b   : > { %579 = vmatprep.mubr.f32.mxu1 %v1712_v2 }
  0x3e   : > { %1402 = vmatmul.mubr.msk.f32.gmra.mxu1 %vm405_vm1, %v480_v14 }
  0x3f   : > { %585 = vmatprep.mubr.f32.mxu1 %v1712_v2 }
  0x42   : > { %1403 = vmatmul.mubr.msk.f32.gmra.mxu1 %vm405_vm1, %v481_v15 }
  0xad   : > { %v403_v16 = vpop.permute.xlu0 %402 }
  0xb1   : > { %v498_v25 = vpop.permute.xlu0 %497 }
  0xf5   : > { %v475_v17 = vpop.f32.mrf.mxu0 }
  0xf6   : > { %v476_v18 = vadd.f32 %v475_v17, %v403_v16 }
  0xf7   : > { %v1443_v19 = vpop.f32.mrf.mxu0 }
  0xf8   : > { %592 = vxpose.xlu1.b32.start.end [1/1] (short) %v476_v18, 128 }
  0xfa   : > { %v1897_v20 = vpop.f32.mrf.mxu1 }
  0xfc   : > { %v1899_v21 = vpop.f32.mrf.mxu1 }
  0xfe   : > { %v1901_v22 = vpop.f32.mrf.mxu1 }
 0x100   : > { %v1903_v23 = vpop.f32.mrf.mxu1 }
 0x102   : > { %v587_v24 = vpop.f32.mrf.mxu1 }
 0x103   : > { %v588_v28 = vadd.f32 %v587_v24, %v498_v25 }
 0x104   : > { %v589_v26 = vpop.f32.mrf.mxu1 }
 0x105   : > { %v590_v27 = vadd.f32 %v589_v26, %v498_v25 }
 0x107   : > { %1404 = vmatprep.subr.msk.mxu0 %vm673_vm2, %v590_v27 }
 0x108   : > { %1405 = vmatpush1.msk.msra.mxu0 %vm673_vm2, %v588_v28 }
 0x116   : > { %1521 = vset.pattern.permute.xlu1 %v1714_v6 }
 0x174   : > { %v608_v29 = vpop.trf.xlu1 }
 0x175   : > { %1406 = vmatmul.mubr.msk.f32.vlgmr.msra.gmra.mxu0 %vm624_vm3, %v608_v29 }
 0x176   : > { %750 = vmatprep.mubr.f32.mxu0 %v1712_v2 }
 0x178   : > { %v609_v30 = vpop.trf.xlu1 }
 0x179   : > { %1407 = vmatmul.mubr.msk.f32.gmra.mxu0 %vm624_vm3, %v609_v30 }
 0x17a   : > { %756 = vmatprep.mubr.f32.mxu0 %v1712_v2 }
 0x17c   : > { %v610_v31 = vpop.trf.xlu1 }
 0x17d   : > { %1408 = vmatmul.mubr.msk.f32.gmra.mxu0 %vm624_vm3, %v610_v31 }
 0x17e   : > { %762 = vmatprep.mubr.f32.mxu0 %v1712_v2 }
 0x180   : > { %v611_v32 = vpop.trf.xlu1 }
 0x181   : > { %1409 = vmatmul.mubr.msk.f32.gmra.mxu0 %vm624_vm3, %v611_v32 }
 0x182   : > { %768 = vmatprep.mubr.f32.mxu0 %v1712_v2 }
 0x184   : > { %v612_v33 = vpop.trf.xlu1 }
 0x185   : > { %1410 = vmatmul.mubr.msk.f32.gmra.mxu0 %vm624_vm3, %v612_v33 }
 0x186   : > { %774 = vmatprep.mubr.f32.mxu0 %v1712_v2 }
 0x188   : > { %v613_v34 = vpop.trf.xlu1 }
 0x189   : > { %1411 = vmatmul.mubr.msk.f32.gmra.mxu0 %vm624_vm3, %v613_v34 }
 0x18a   : > { %780 = vmatprep.mubr.f32.mxu0 %v1712_v2 }
 0x18c   : > { %v614_v35 = vpop.trf.xlu1 }
 0x18d   : > { %1412 = vmatmul.mubr.msk.f32.gmra.mxu0 %vm624_vm3, %v614_v35 }
 0x18e   : > { %786 = vmatprep.mubr.f32.mxu0 %v1712_v2 }
 0x190   : > { %v615_v36 = vpop.trf.xlu1 }
 0x191   : > { %1413 = vmatmul.mubr.msk.f32.gmra.mxu0 %vm624_vm3, %v615_v36 }
 0x192   : > { %792 = vmatprep.mubr.f32.mxu0 %v1712_v2 }
 0x194   : > { %v616_v37 = vpop.trf.xlu1 }
 0x195   : > { %1414 = vmatmul.mubr.msk.f32.gmra.mxu0 %vm624_vm3, %v616_v37 }
 0x196   : > { %798 = vmatprep.mubr.f32.mxu0 %v1712_v2 }
 0x198   : > { %v617_v38 = vpop.trf.xlu1 }
 0x199   : > { %1415 = vmatmul.mubr.msk.f32.gmra.mxu0 %vm624_vm3, %v617_v38 }
 0x19a   : > { %804 = vmatprep.mubr.f32.mxu0 %v1712_v2 }
 0x19c   : > { %v618_v39 = vpop.trf.xlu1 }
 0x19d   : > { %1416 = vmatmul.mubr.msk.f32.gmra.mxu0 %vm624_vm3, %v618_v39 }
 0x19e   : > { %810 = vmatprep.mubr.f32.mxu0 %v1712_v2 }
 0x1a0   : > { %v619_v40 = vpop.trf.xlu1 }
 0x1a1   : > { %1417 = vmatmul.mubr.msk.f32.gmra.mxu0 %vm624_vm3, %v619_v40 }
 0x1a2   : > { %816 = vmatprep.mubr.f32.mxu0 %v1712_v2 }
 0x1a4   : > { %v620_v41 = vpop.trf.xlu1 }
 0x1a5   : > { %1418 = vmatmul.mubr.msk.f32.gmra.mxu0 %vm624_vm3, %v620_v41 }
 0x1a6   : > { %822 = vmatprep.mubr.f32.mxu0 %v1712_v2 }
 0x1a8   : > { %v621_v42 = vpop.trf.xlu1 }
 0x1a9   : > { %1419 = vmatmul.mubr.msk.f32.gmra.mxu0 %vm624_vm3, %v621_v42 }
 0x1aa   : > { %828 = vmatprep.mubr.f32.mxu0 %v1712_v2 }
 0x1ac   : > { %v622_v43 = vpop.trf.xlu1 }
 0x1ad   : > { %1420 = vmatmul.mubr.msk.f32.gmra.mxu0 %vm624_vm3, %v622_v43 }
 0x1ae   : > { %834 = vmatprep.mubr.f32.mxu0 %v1712_v2 }
 0x1b0   : > { %v623_v44 = vpop.trf.xlu1 }
 0x1b1   : > { %1421 = vmatmul.mubr.msk.f32.gmra.mxu0 %vm624_vm3, %v623_v44 }
 0x235   : > { %v1936_v45 = vpop.f32.mrf.mxu0 }
 0x237   : > { %v1938_v46 = vpop.f32.mrf.mxu0 }
 0x238   : > { %v841_v34 = vmax.f32 %v1936_v45, %v1938_v46 }
 0x239   : > { %v1940_v47 = vpop.f32.mrf.mxu0 }
 0x23b   : > { %v1942_v48 = vpop.f32.mrf.mxu0 }
 0x23c   : > { %v844_v33 = vmax.f32 %v1940_v47, %v1942_v48 }
 0x23d   : > { %v1944_v49 = vpop.f32.mrf.mxu0 }
 0x23f   : > { %v1946_v50 = vpop.f32.mrf.mxu0 }
 0x240   : > { %v847_v32 = vmax.f32 %v1944_v49, %v1946_v50 }
 0x241   : > { %v1948_v51 = vpop.f32.mrf.mxu0 }
 0x243   : > { %v1950_v52 = vpop.f32.mrf.mxu0 }
 0x244   : > { %v850_v31 = vmax.f32 %v1948_v51, %v1950_v52 }
 0x245   : > { %v1952_v53 = vpop.f32.mrf.mxu0 }
 0x247   : > { %v1954_v54 = vpop.f32.mrf.mxu0 }
 0x248   : > { %v853_v30 = vmax.f32 %v1952_v53, %v1954_v54 }
 0x249   : > { %v1956_v55 = vpop.f32.mrf.mxu0 }
 0x24b   : > { %v1958_v56 = vpop.f32.mrf.mxu0 }
 0x24c   : > { %v856_v29 = vmax.f32 %v1956_v55, %v1958_v56 }
 0x24d   : > { %v1960_v57 = vpop.f32.mrf.mxu0 }
 0x24f   : > { %v1962_v58 = vpop.f32.mrf.mxu0 }
 0x250   : > { %v859_v28 = vmax.f32 %v1960_v57, %v1962_v58 }
 0x251   : > { %v1964_v59 = vpop.f32.mrf.mxu0 }
 0x253   : > { %v1966_v60 = vpop.f32.mrf.mxu0 }
 0x254   : > { %v862_v27 = vmax.f32 %v1964_v59, %v1966_v60 }
 0x255   : > { %v1968_v61 = vpop.f32.mrf.mxu0 }
 0x257   : > { %v1970_v62 = vpop.f32.mrf.mxu0 }
 0x258   : > { %v865_v26 = vmax.f32 %v1968_v61, %v1970_v62 }
 0x259   : > { %v1972_v63 = vpop.f32.mrf.mxu0 }
 0x25b   : > { %v1974_v0 = vpop.f32.mrf.mxu0 }
 0x25c   : > { %v868_v25 = vmax.f32 %v1972_v63, %v1974_v0 }
 0x25d   : > { %v1976_v1 = vpop.f32.mrf.mxu0 }
 0x25f   : > { %v1978_v2 = vpop.f32.mrf.mxu0 }
 0x260   : > { %v871_v24 = vmax.f32 %v1976_v1, %v1978_v2 }
 0x261   : > { %v1980_v3 = vpop.f32.mrf.mxu0 }
 0x263   : > { %v1982_v6 = vpop.f32.mrf.mxu0 }
 0x264   : > { %v874_v19 = vmax.f32 %v1980_v3, %v1982_v6 }
 0x265   : > { %v818_v7 = vpop.f32.mrf.mxu0 }
 0x267   : > { %v820_v8 = vpop.f32.mrf.mxu0 }
 0x268   : > { %v877_v18 = vmax.f32 %v818_v7, %v820_v8 }
 0x269   : > { %v824_v9 = vpop.f32.mrf.mxu0 }
 0x26b   : > { %v1984_v10 = vpop.f32.mrf.mxu0 }
 0x26c   : > { %v880_v17 = vmax.f32 %v824_v9, %v1984_v10 }
 0x26d   : > { %v830_v11 = vpop.f32.mrf.mxu0 }
 0x26f   : > { %v832_v12 = vpop.f32.mrf.mxu0 }
 0x270   : > { %v883_v13 = vmax.f32 %v830_v11, %v832_v12 }
 0x271   : > { %v836_v14 = vpop.f32.mrf.mxu0 }
 0x272   : > { %884 = vmax.xlane.f32.xlu0 %v883_v13 }
 0x273   : > { %v838_v15 = vpop.f32.mrf.mxu0 }
 0x274   : > { %v886_v16 = vmax.f32 %v836_v14, %v838_v15 }
 0x276   : > { %881 = vmax.xlane.f32.xlu0 %v880_v17  ;;  %887 = vmax.xlane.f32.xlu1 %v886_v16 }
 0x27a   : > { %878 = vmax.xlane.f32.xlu0 %v877_v18 }
 0x27e   : > { %875 = vmax.xlane.f32.xlu0 %v874_v19 }
 0x282   : > { %872 = vmax.xlane.f32.xlu0 %v871_v24 }
 0x286   : > { %869 = vmax.xlane.f32.xlu0 %v868_v25 }
 0x28a   : > { %866 = vmax.xlane.f32.xlu0 %v865_v26 }
 0x28e   : > { %863 = vmax.xlane.f32.xlu0 %v862_v27 }
 0x292   : > { %860 = vmax.xlane.f32.xlu0 %v859_v28 }
 0x296   : > { %857 = vmax.xlane.f32.xlu0 %v856_v29 }
 0x29a   : > { %854 = vmax.xlane.f32.xlu0 %v853_v30 }
 0x29e   : > { %851 = vmax.xlane.f32.xlu0 %v850_v31 }
 0x2a2   : > { %848 = vmax.xlane.f32.xlu0 %v847_v32 }
 0x2a6   : > { %845 = vmax.xlane.f32.xlu0 %v844_v33 }
 0x2aa   : > { %842 = vmax.xlane.f32.xlu0 %v841_v34 }
 0x2fb   : > { %v885_v35 = vpop.xlane.xlu0 %884 }
 0x2fc   : > { %v917_v36 = vsub.f32 %v830_v11, %v885_v35  ;;  %v918_v37 = vsub.f32 %v832_v12, %v885_v35 }
 0x2fe   : > { %v977_v40 = vmul.f32 1.442695, %v917_v36  ;;  %v979_v42 = vmul.f32 1.442695, %v918_v37 }
 0x2ff   : > { %v882_v38 = vpop.xlane.xlu0 %881  ;;  %v888_v39 = vpop.xlane.xlu1 %887 }
 0x300   : > { %v919_v41 = vsub.f32 %v836_v14, %v888_v39  ;;  %v920_v43 = vsub.f32 %v838_v15, %v888_v39  ;;  %1522 = vpow2.f32 %v977_v40  ;;  %v915_v17 = vsub.f32 %v824_v9, %v882_v38 }
 0x301   : > { %1524 = vpow2.f32 %v979_v42  ;;  %v916_v24 = vsub.f32 %v1984_v10, %v882_v38 }
 0x302   : > { %v981_v44 = vmul.f32 1.442695, %v919_v41  ;;  %v983_v13 = vmul.f32 1.442695, %v920_v43  ;;  %v973_v26 = vmul.f32 1.442695, %v915_v17 }
 0x303   : > { %v879_v16 = vpop.xlane.xlu0 %878  ;;  %v975_v27 = vmul.f32 1.442695, %v916_v24 }
 0x304   : > { %v913_v18 = vsub.f32 %v818_v7, %v879_v16  ;;  %v914_v19 = vsub.f32 %v820_v8, %v879_v16  ;;  %1526 = vpow2.f32 %v981_v44 }
 0x305   : > { %1528 = vpow2.f32 %v983_v13 }
 0x306   : > { %v969_v25 = vmul.f32 1.442695, %v913_v18  ;;  %v971_v11 = vmul.f32 1.442695, %v914_v19 }
 0x307   : > { %v876_v12 = vpop.xlane.xlu0 %875 }
 0x308   : > { %1530 = vpow2.f32 %v969_v25  ;;  %v911_v14 = vsub.f32 %v1980_v3, %v876_v12  ;;  %v912_v15 = vsub.f32 %v1982_v6, %v876_v12 }
 0x309   : > { %1532 = vpow2.f32 %v971_v11 }
 0x30a   : > { %v965_v28 = vmul.f32 1.442695, %v911_v14  ;;  %v967_v9 = vmul.f32 1.442695, %v912_v15  ;;  %1534 = vpow2.f32 %v973_v26 }
 0x30b   : > { %v873_v7 = vpop.xlane.xlu0 %872  ;;  %1536 = vpow2.f32 %v975_v27 }
 0x30c   : > { %v909_v8 = vsub.f32 %v1976_v1, %v873_v7  ;;  %v910_v10 = vsub.f32 %v1978_v2, %v873_v7  ;;  %1538 = vpow2.f32 %v965_v28 }
 0x30d   : > { %1540 = vpow2.f32 %v967_v9  ;;  %v2018_v32 = vpop.eup %1522 }
 0x30e   : > { %v961_v29 = vmul.f32 1.442695, %v909_v8  ;;  %v963_v30 = vmul.f32 1.442695, %v910_v10  ;;  %v2020_v33 = vpop.eup %1524 }
 0x30f   : > { %v870_v31 = vpop.xlane.xlu0 %869  ;;  %v1027_v13 = vadd.f32 %v2020_v33, %v2018_v32 }
 0x310   : > { %1542 = vpow2.f32 %v961_v29  ;;  %v907_v3 = vsub.f32 %v1972_v63, %v870_v31  ;;  %v908_v6 = vsub.f32 %v1974_v0, %v870_v31 }
 0x311   : > { %1544 = vpow2.f32 %v963_v30  ;;  %v2022_v35 = vpop.eup %1526 }
 0x312   : > { %v957_v34 = vmul.f32 1.442695, %v907_v3  ;;  %v959_v1 = vmul.f32 1.442695, %v908_v6  ;;  %v2024_v36 = vpop.eup %1528 }
 0x313   : > { %v867_v2 = vpop.xlane.xlu0 %866  ;;  %v1030_v0 = vadd.f32 %v2024_v36, %v2022_v35 }
 0x314   : > { %1546 = vpow2.f32 %v957_v34  ;;  %v905_v37 = vsub.f32 %v1968_v61, %v867_v2  ;;  %v906_v38 = vsub.f32 %v1970_v62, %v867_v2 }
 0x315   : > { %v2028_v63 = vpop.eup %1530  ;;  %1548 = vpow2.f32 %v959_v1  ;;  %1031 = vadd.xlane.f32.xlu0 %v1030_v0 }
 0x316   : > { %v2032_v39 = vpop.eup %1532  ;;  %v953_v40 = vmul.f32 1.442695, %v905_v37  ;;  %v955_v41 = vmul.f32 1.442695, %v906_v38 }
 0x317   : > { %v864_v42 = vpop.xlane.xlu0 %863  ;;  %v1021_v43 = vadd.f32 %v2032_v39, %v2028_v63  ;;  %v2038_v44 = vpop.eup %1534 }
 0x318   : > { %1550 = vpow2.f32 %v953_v40  ;;  %v903_v61 = vsub.f32 %v1964_v59, %v864_v42  ;;  %v904_v62 = vsub.f32 %v1966_v60, %v864_v42  ;;  %v2042_v16 = vpop.eup %1536 }
 0x319   : > { %1552 = vpow2.f32 %v955_v41  ;;  %1022 = vadd.xlane.f32.xlu1 %v1021_v43  ;;  %v2044_v19 = vpop.eup %1538  ;;  %1028 = vadd.xlane.f32.xlu0 %v1027_v13  ;;  %v1024_v12 = vadd.f32 %v2042_v16, %v2038_v44 }
 0x31a   : > { %v949_v17 = vmul.f32 1.442695, %v903_v61  ;;  %v951_v18 = vmul.f32 1.442695, %v904_v62  ;;  %v2046_v25 = vpop.eup %1540 }
 0x31b   : > { %v861_v24 = vpop.xlane.xlu0 %860  ;;  %v1018_v7 = vadd.f32 %v2046_v25, %v2044_v19 }
 0x31c   : > { %1554 = vpow2.f32 %v949_v17  ;;  %v901_v59 = vsub.f32 %v1960_v57, %v861_v24  ;;  %v902_v60 = vsub.f32 %v1962_v58, %v861_v24 }
 0x31d   : > { %v2050_v11 = vpop.eup %1542  ;;  %1556 = vpow2.f32 %v951_v18  ;;  %1025 = vadd.xlane.f32.xlu0 %v1024_v12 }
 0x31e   : > { %v2054_v26 = vpop.eup %1544  ;;  %v945_v14 = vmul.f32 1.442695, %v901_v59  ;;  %v947_v15 = vmul.f32 1.442695, %v902_v60 }
 0x31f   : > { %v858_v27 = vpop.xlane.xlu0 %857  ;;  %v1015_v28 = vadd.f32 %v2054_v26, %v2050_v11 }
 0x320   : > { %1558 = vpow2.f32 %v945_v14  ;;  %v899_v57 = vsub.f32 %v1956_v55, %v858_v27  ;;  %v900_v58 = vsub.f32 %v1958_v56, %v858_v27 }
 0x321   : > { %v2060_v9 = vpop.eup %1546  ;;  %1560 = vpow2.f32 %v947_v15  ;;  %1016 = vadd.xlane.f32.xlu1 %v1015_v28  ;;  %1019 = vadd.xlane.f32.xlu0 %v1018_v7 }
 0x322   : > { %v2064_v8 = vpop.eup %1548  ;;  %v941_v10 = vmul.f32 1.442695, %v899_v57  ;;  %v943_v29 = vmul.f32 1.442695, %v900_v58 }
 0x323   : > { %v855_v30 = vpop.xlane.xlu0 %854  ;;  %v1012_v31 = vadd.f32 %v2064_v8, %v2060_v9 }
 0x324   : > { %1562 = vpow2.f32 %v941_v10  ;;  %v897_v55 = vsub.f32 %v1952_v53, %v855_v30  ;;  %v898_v56 = vsub.f32 %v1954_v54, %v855_v30 }
 0x325   : > { %v2070_v3 = vpop.eup %1550  ;;  %1564 = vpow2.f32 %v943_v29  ;;  %1013 = vadd.xlane.f32.xlu0 %v1012_v31 }
 0x326   : > { %v2072_v6 = vpop.eup %1552  ;;  %v937_v34 = vmul.f32 1.442695, %v897_v55  ;;  %v939_v1 = vmul.f32 1.442695, %v898_v56 }
 0x327   : > { %v852_v2 = vpop.xlane.xlu0 %851  ;;  %v1009_v37 = vadd.f32 %v2072_v6, %v2070_v3 }
 0x328   : > { %1566 = vpow2.f32 %v937_v34  ;;  %v895_v38 = vsub.f32 %v1948_v51, %v852_v2  ;;  %v896_v0 = vsub.f32 %v1950_v52, %v852_v2 }
 0x329   : > { %v2078_v53 = vpop.eup %1554  ;;  %1568 = vpow2.f32 %v939_v1  ;;  %1010 = vadd.xlane.f32.xlu1 %v1009_v37 }
 0x32a   : > { %v2080_v54 = vpop.eup %1556  ;;  %v933_v40 = vmul.f32 1.442695, %v895_v38  ;;  %v935_v41 = vmul.f32 1.442695, %v896_v0  ;;  %v483_v0 = vld [vmem:[%s2286_s5 + $0x8] sm:$0xff] }
 0x32b   : > { %v849_v42 = vpop.xlane.xlu0 %848  ;;  %v1006_v43 = vadd.f32 %v2080_v54, %v2078_v53 }
 0x32c   : > { %1570 = vpow2.f32 %v933_v40  ;;  %v893_v61 = vsub.f32 %v1944_v49, %v849_v42  ;;  %v894_v62 = vsub.f32 %v1946_v50, %v849_v42  ;;  %v482_v40 = vld [vmem:[%s2286_s5] sm:$0xff] }
 0x32d   : > { %v2086_v51 = vpop.eup %1558  ;;  %1572 = vpow2.f32 %v935_v41  ;;  %1007 = vadd.xlane.f32.xlu0 %v1006_v43 }
 0x32e   : > { %v2088_v52 = vpop.eup %1560  ;;  %v929_v13 = vmul.f32 1.442695, %v893_v61  ;;  %v931_v17 = vmul.f32 1.442695, %v894_v62 }
 0x32f   : > { %v846_v18 = vpop.xlane.xlu0 %845  ;;  %v1003_v24 = vadd.f32 %v2088_v52, %v2086_v51 }
 0x330   : > { %1574 = vpow2.f32 %v929_v13  ;;  %v891_v59 = vsub.f32 %v1940_v47, %v846_v18  ;;  %v892_v60 = vsub.f32 %v1942_v48, %v846_v18 }
 0x331   : > { %v2094_v49 = vpop.eup %1562  ;;  %1576 = vpow2.f32 %v931_v17  ;;  %1004 = vadd.xlane.f32.xlu1 %v1003_v24 }
 0x332   : > { %v2096_v50 = vpop.eup %1564  ;;  %v925_v12 = vmul.f32 1.442695, %v891_v59  ;;  %v927_v14 = vmul.f32 1.442695, %v892_v60 }
 0x333   : > { %v843_v15 = vpop.xlane.xlu0 %842  ;;  %v1000_v27 = vadd.f32 %v2096_v50, %v2094_v49 }
 0x334   : > { %1578 = vpow2.f32 %v925_v12  ;;  %v889_v28 = vsub.f32 %v1936_v45, %v843_v15  ;;  %v890_v57 = vsub.f32 %v1938_v46, %v843_v15 }
 0x335   : > { %v2102_v47 = vpop.eup %1566  ;;  %1580 = vpow2.f32 %v927_v14  ;;  %1001 = vadd.xlane.f32.xlu0 %v1000_v27 }
 0x336   : > { %v2104_v48 = vpop.eup %1568  ;;  %v921_v58 = vmul.f32 1.442695, %v889_v28  ;;  %v923_v7 = vmul.f32 1.442695, %v890_v57 }
 0x337   : > { %v997_v10 = vadd.f32 %v2104_v48, %v2102_v47 }
 0x338   : > { %1582 = vpow2.f32 %v921_v58 }
 0x339   : > { %v2108_v29 = vpop.eup %1570  ;;  %1584 = vpow2.f32 %v923_v7  ;;  %998 = vadd.xlane.f32.xlu1 %v997_v10 }
 0x33a   : > { %v2110_v30 = vpop.eup %1572 }
 0x33b   : > { %v994_v45 = vadd.f32 %v2110_v30, %v2108_v29 }
 0x33d   : > { %v2114_v46 = vpop.eup %1574  ;;  %995 = vadd.xlane.f32.xlu0 %v994_v45 }
 0x33e   : > { %v2116_v31 = vpop.eup %1576 }
 0x33f   : > { %v991_v55 = vadd.f32 %v2116_v31, %v2114_v46 }
 0x341   : > { %v2120_v56 = vpop.eup %1578  ;;  %992 = vadd.xlane.f32.xlu1 %v991_v55 }
 0x342   : > { %v2122_v34 = vpop.eup %1580 }
 0x343   : > { %v988_v1 = vadd.f32 %v2122_v34, %v2120_v56 }
 0x345   : > { %v2126_v2 = vpop.eup %1582  ;;  %989 = vadd.xlane.f32.xlu0 %v988_v1 }
 0x346   : > { %v2128_v37 = vpop.eup %1584 }
 0x347   : > { %v985_v38 = vadd.f32 %v2128_v37, %v2126_v2 }
 0x349   : > { %986 = vadd.xlane.f32.xlu1 %v985_v38 }
 0x35a   : > { %492 = vperm.xlu1 %1521, %v483_v0  }
 0x35b   : > { %487 = vperm.xlu0 %1520, %v482_v40  }
 0x39e   : > { %v1032_v41 = vpop.xlane.xlu0 %1031 }
 0x39f   : > { %1586 = vrcp.f32 %v1032_v41 }
 0x3a2   : > { %v1023_v42 = vpop.xlane.xlu1 %1022  ;;  %v1029_v43 = vpop.xlane.xlu0 %1028 }
 0x3a3   : > { %1588 = vrcp.f32 %v1023_v42 }
 0x3a4   : > { %1590 = vrcp.f32 %v1029_v43 }
 0x3a6   : > { %v1026_v61 = vpop.xlane.xlu0 %1025 }
 0x3a7   : > { %1592 = vrcp.f32 %v1026_v61 }
 0x3aa   : > { %v1017_v62 = vpop.xlane.xlu1 %1016  ;;  %v1020_v13 = vpop.xlane.xlu0 %1019 }
 0x3ab   : > { %1594 = vrcp.f32 %v1017_v62 }
 0x3ac   : > { %1596 = vrcp.f32 %v1020_v13  ;;  %v1587_v17 = vpop.eup %1586 }
 0x3ad   : > { %v1080_v18 = vmul.f32 %v1587_v17, %v2024_v36  ;;  %v1079_v24 = vmul.f32 %v1587_v17, %v2022_v35 }
 0x3ae   : > { %v1014_v60 = vpop.xlane.xlu0 %1013 }
 0x3af   : > { %1598 = vrcp.f32 %v1014_v60  ;;  %1081 = vmatprep.subr.mxu1 %v1080_v18  ;;  %1195 = vst [vmem:[%s2141_s15 + $0xf8] sm:$0xff] %v1080_v18  ;;  %1194 = vst [vmem:[%s2141_s15 + $0xf0] sm:$0xff] %v1079_v24 }
 0x3b0   : > { %v1589_v59 = vpop.eup %1588  ;;  %1082 = vmatpush1.xpose.msra.mxu1 %v1079_v24 }
 0x3b1   : > { %v1074_v12 = vmul.f32 %v1589_v59, %v2032_v39  ;;  %v1073_v36 = vmul.f32 %v1589_v59, %v2028_v63  ;;  %v1591_v14 = vpop.eup %1590 }
 0x3b2   : > { %v1011_v35 = vpop.xlane.xlu1 %1010  ;;  %v1078_v15 = vmul.f32 %v1591_v14, %v2020_v33  ;;  %v1077_v27 = vmul.f32 %v1591_v14, %v2018_v32 }
 0x3b3   : > { %1600 = vrcp.f32 %v1011_v35  ;;  %1189 = vst [vmem:[%s2141_s15 + $0xc8] sm:$0xff] %v1074_v12  ;;  %1188 = vst [vmem:[%s2141_s15 + $0xc0] sm:$0xff] %v1073_v36 }
 0x3b4   : > { %1083 = vmatprep.subr.mxu1 %v1078_v15  ;;  %1193 = vst [vmem:[%s2141_s15 + $0xe8] sm:$0xff] %v1078_v15  ;;  %1192 = vst [vmem:[%s2141_s15 + $0xe0] sm:$0xff] %v1077_v27  ;;  %v1593_v28 = vpop.eup %1592 }
 0x3b5   : > { %1084 = vmatpush1.xpose.msra.mxu1 %v1077_v27  ;;  %v1076_v63 = vmul.f32 %v1593_v28, %v2042_v16  ;;  %v1075_v57 = vmul.f32 %v1593_v28, %v2038_v44 }
 0x3b6   : > { %v1008_v39 = vpop.xlane.xlu0 %1007 }
 0x3b7   : > { %1602 = vrcp.f32 %v1008_v39  ;;  %1085 = vmatprep.subr.mxu1 %v1076_v63  ;;  %1191 = vst [vmem:[%s2141_s15 + $0xd8] sm:$0xff] %v1076_v63  ;;  %1190 = vst [vmem:[%s2141_s15 + $0xd0] sm:$0xff] %v1075_v57 }
 0x3b8   : > { %v1595_v33 = vpop.eup %1594 }
 0x3b9   : > { %v1070_v32 = vmul.f32 %v1595_v33, %v2054_v26  ;;  %v1069_v58 = vmul.f32 %v1595_v33, %v2050_v11  ;;  %v1597_v7 = vpop.eup %1596  ;;  %1086 = vmatpush1.xpose.msra.mxu1 %v1075_v57 }
 0x3ba   : > { %v1005_v10 = vpop.xlane.xlu1 %1004  ;;  %1087 = vmatprep.subr.mxu1 %v1074_v12  ;;  %v1072_v16 = vmul.f32 %v1597_v7, %v2046_v25  ;;  %v1071_v44 = vmul.f32 %v1597_v7, %v2044_v19 }
 0x3bb   : > { %1604 = vrcp.f32 %v1005_v10  ;;  %1185 = vst [vmem:[%s2141_s15 + $0xa8] sm:$0xff] %v1070_v32  ;;  %1184 = vst [vmem:[%s2141_s15 + $0xa0] sm:$0xff] %v1069_v58 }
 0x3bc   : > { %1187 = vst [vmem:[%s2141_s15 + $0xb8] sm:$0xff] %v1072_v16  ;;  %1186 = vst [vmem:[%s2141_s15 + $0xb0] sm:$0xff] %v1071_v44  ;;  %v1599_v45 = vpop.eup %1598 }
 0x3bd   : > { %1088 = vmatpush1.xpose.msra.mxu1 %v1073_v36  ;;  %v1068_v26 = vmul.f32 %v1599_v45, %v2064_v8  ;;  %v1067_v55 = vmul.f32 %v1599_v45, %v2060_v9 }
 0x3be   : > { %v1002_v11 = vpop.xlane.xlu0 %1001  ;;  %1089 = vmatprep.subr.mxu1 %v1072_v16 }
 0x3bf   : > { %1606 = vrcp.f32 %v1002_v11  ;;  %1183 = vst [vmem:[%s2141_s15 + $0x98] sm:$0xff] %v1068_v26  ;;  %1182 = vst [vmem:[%s2141_s15 + $0x90] sm:$0xff] %v1067_v55 }
 0x3c0   : > { %v1601_v1 = vpop.eup %1600 }
 0x3c1   : > { %v1066_v19 = vmul.f32 %v1601_v1, %v2072_v6  ;;  %v1065_v25 = vmul.f32 %v1601_v1, %v2070_v3  ;;  %1090 = vmatpush1.xpose.msra.mxu1 %v1071_v44 }
 0x3c2   : > { %v999_v38 = vpop.xlane.xlu1 %998  ;;  %1091 = vmatprep.subr.mxu1 %v1070_v32 }
 0x3c3   : > { %1608 = vrcp.f32 %v999_v38  ;;  %1181 = vst [vmem:[%s2141_s15 + $0x88] sm:$0xff] %v1066_v19  ;;  %1180 = vst [vmem:[%s2141_s15 + $0x80] sm:$0xff] %v1065_v25 }
 0x3c4   : > { %v1603_v0 = vpop.eup %1602 }
 0x3c5   : > { %v1064_v8 = vmul.f32 %v1603_v0, %v2080_v54  ;;  %v1063_v9 = vmul.f32 %v1603_v0, %v2078_v53  ;;  %1092 = vmatpush1.xpose.msra.mxu1 %v1069_v58 }
 0x3c6   : > { %v996_v40 = vpop.xlane.xlu0 %995  ;;  %1093 = vmatprep.subr.mxu1 %v1068_v26 }
 0x3c7   : > { %1610 = vrcp.f32 %v996_v40  ;;  %1179 = vst [vmem:[%s2141_s15 + $0x78] sm:$0xff] %v1064_v8  ;;  %1178 = vst [vmem:[%s2141_s15 + $0x70] sm:$0xff] %v1063_v9 }
 0x3c8   : > { %v1605_v3 = vpop.eup %1604 }
 0x3c9   : > { %v1062_v6 = vmul.f32 %v1605_v3, %v2088_v52  ;;  %v1061_v41 = vmul.f32 %v1605_v3, %v2086_v51  ;;  %1094 = vmatpush1.xpose.msra.mxu1 %v1067_v55 }
 0x3ca   : > { %v993_v42 = vpop.xlane.xlu1 %992  ;;  %1095 = vmatprep.subr.mxu1 %v1066_v19 }
 0x3cb   : > { %1612 = vrcp.f32 %v993_v42  ;;  %1177 = vst [vmem:[%s2141_s15 + $0x68] sm:$0xff] %v1062_v6  ;;  %1176 = vst [vmem:[%s2141_s15 + $0x60] sm:$0xff] %v1061_v41 }
 0x3cc   : > { %v1607_v53 = vpop.eup %1606 }
 0x3cd   : > { %v1060_v54 = vmul.f32 %v1607_v53, %v2096_v50  ;;  %v1059_v43 = vmul.f32 %v1607_v53, %v2094_v49  ;;  %1096 = vmatpush1.xpose.msra.mxu1 %v1065_v25 }
 0x3ce   : > { %v990_v61 = vpop.xlane.xlu0 %989  ;;  %1097 = vmatprep.subr.mxu1 %v1064_v8 }
 0x3cf   : > { %1614 = vrcp.f32 %v990_v61  ;;  %1175 = vst [vmem:[%s2141_s15 + $0x58] sm:$0xff] %v1060_v54  ;;  %1174 = vst [vmem:[%s2141_s15 + $0x50] sm:$0xff] %v1059_v43 }
 0x3d0   : > { %v1609_v51 = vpop.eup %1608 }
 0x3d1   : > { %v1058_v52 = vmul.f32 %v1609_v51, %v2104_v48  ;;  %v1057_v62 = vmul.f32 %v1609_v51, %v2102_v47  ;;  %1098 = vmatpush1.xpose.msra.mxu1 %v1063_v9 }
 0x3d2   : > { %v987_v13 = vpop.xlane.xlu1 %986  ;;  %1099 = vmatprep.subr.mxu1 %v1062_v6 }
 0x3d3   : > { %1616 = vrcp.f32 %v987_v13  ;;  %1173 = vst [vmem:[%s2141_s15 + $0x48] sm:$0xff] %v1058_v52  ;;  %1172 = vst [vmem:[%s2141_s15 + $0x40] sm:$0xff] %v1057_v62 }
 0x3d4   : > { %v1611_v49 = vpop.eup %1610 }
 0x3d5   : > { %v1056_v50 = vmul.f32 %v1611_v49, %v2110_v30  ;;  %v1055_v17 = vmul.f32 %v1611_v49, %v2108_v29  ;;  %1100 = vmatpush1.xpose.msra.mxu1 %v1061_v41 }
 0x3d6   : > { %v488_v18 = vpop.permute.xlu0 %487  ;;  %1101 = vmatprep.subr.mxu1 %v1060_v54 }
 0x3d7   : > { %v578_v48 = vadd.f32 %v1899_v21, %v488_v18  ;;  %1171 = vst [vmem:[%s2141_s15 + $0x38] sm:$0xff] %v1056_v50  ;;  %1170 = vst [vmem:[%s2141_s15 + $0x30] sm:$0xff] %v1055_v17 }
 0x3d8   : > { %v1613_v47 = vpop.eup %1612 }
 0x3d9   : > { %1145 = vmatprep.mubr.f32.mxu1 %v578_v48  ;;  %v1054_v24 = vmul.f32 %v1613_v47, %v2116_v31  ;;  %v1053_v59 = vmul.f32 %v1613_v47, %v2114_v46  ;;  %1102 = vmatpush1.xpose.msra.mxu1 %v1059_v43 }
 0x3da   : > { %1103 = vmatprep.subr.mxu1 %v1058_v52 }
 0x3db   : > { %1169 = vst [vmem:[%s2141_s15 + $0x28] sm:$0xff] %v1054_v24  ;;  %1168 = vst [vmem:[%s2141_s15 + $0x20] sm:$0xff] %v1053_v59 }
 0x3dc   : > { %v1615_v29 = vpop.eup %1614 }
 0x3dd   : > { %v1052_v30 = vmul.f32 %v1615_v29, %v2122_v34  ;;  %v1051_v21 = vmul.f32 %v1615_v29, %v2120_v56  ;;  %1104 = vmatpush1.xpose.msra.mxu1 %v1057_v62  ;;  %v493_v34 = vpop.permute.xlu1 %492  ;;  %v576_v56 = vadd.f32 %v1897_v20, %v488_v18 }
 0x3de   : > { %1105 = vmatprep.subr.mxu1 %v1056_v50  ;;  %v584_v12 = vadd.f32 %v1903_v23, %v493_v34 }
 0x3df   : > { %1167 = vst [vmem:[%s2141_s15 + $0x18] sm:$0xff] %v1052_v30  ;;  %1166 = vst [vmem:[%s2141_s15 + $0x10] sm:$0xff] %v1051_v21 }
 0x3e0   : > { %v1617_v60 = vpop.eup %1616 }
 0x3e1   : > { %v1050_v31 = vmul.f32 %v1617_v60, %v2128_v37  ;;  %v1049_v46 = vmul.f32 %v1617_v60, %v2126_v2  ;;  %1106 = vmatpush1.xpose.msra.mxu1 %v1055_v17  ;;  %v582_v2 = vadd.f32 %v1901_v22, %v493_v34  ;;  %v1157_v37 = vstv %s1156_s18 }
 0x3e2   : > { %1107 = vmatprep.subr.mxu1 %v1054_v24 }
 0x3e3   : > { %1165 = vst [vmem:[%s2141_s15 + $0x8] sm:$0xff] %v1050_v31  ;;  %1164 = vst [vmem:[%s2141_s15] sm:$0xff] %v1049_v46 }
 0x3e5   : > { %1108 = vmatpush1.xpose.msra.mxu1 %v1053_v59 }
 0x3e6   : > { %1109 = vmatprep.subr.mxu1 %v1052_v30 }
 0x3e9   : > { %1110 = vmatpush1.xpose.msra.mxu1 %v1051_v21 }
 0x3ea   : > { %1111 = vmatprep.subr.mxu1 %v1050_v31 }
 0x3ed   : > { %1112 = vmatpush1.xpose.msra.mxu1 %v1049_v46 }
 0x3f0   : > { %1146 = vmatmul.mubr.f32.vlgmr.msra.gmra.mxu1 %v576_v56 }
 0x3f1   : > { %1150 = vmatprep.mubr.f32.mxu1 %v584_v12 }
 0x3f4   : > { %1151 = vmatmul.mubr.f32.gmra.mxu1 %v582_v2 }
 0x4b0   : > { %v1147_v36 = vpop.f32.mrf.mxu1 }
 0x4b1   : > { %v1158_v14 = vmul.f32 %v1157_v37, %v1147_v36 }
 0x4b2   : > { %v1149_v35 = vpop.f32.mrf.mxu1 }
 0x4b3   : > { %v1160_v15 = vadd.f32 %v1158_v14, %v1865_v5 }
 0x4b4   : > { %v1152_v27 = vpop.f32.mrf.mxu1 }
 0x4b5   : > { %1162 = vst [vmem:[%s378_s22] sm:$0xff] %v1160_v15  ;;  %v1159_v20 = vmul.f32 %v1157_v37, %v1152_v27  ;;  %1207 = sbr.rel (!%p1826_p8) target bundleno = 1218 (0x4c2), region = 90 }
 0x4b6   : > { %v1154_v28 = vpop.f32.mrf.mxu1 }
 0x4b7   : > { %v1161_v23 = vadd.f32 %v1159_v20, %v1863_v4 }
 0x4b9   : > { %1163 = vst [vmem:[%s378_s22 + $0x8] sm:$0xff] %v1161_v23 }
 0x4bc   : > { %v1242_v22 = vld [vmem:[%s378_s22] sm:$0xff] }
 0x4bd   : > { %1243 = vst [vmem:[%s1211_s17] sm:$0xff] %v1242_v22 }
 0x4c0   : > { %v1244_v39 = vld [vmem:[%s378_s22 + $0x8] sm:$0xff] }
 0x4c1   : > { %1245 = vst [vmem:[%s1211_s17 + $0x10] sm:$0xff] %v1244_v39 }
 0x4c2 PF: > { %s1433_s18 = sshll.u32 %s1694_s10, 5  ;;  %s1428_s23 = sshll.u32 %s1698_s11, 6 }
 0x4c3   : > { %s1258_s0 = sadd.s32 %s1433_s18, %s1428_s23  ;;  %s1261_s1 = sshll.u32 %s2141_s15, 4  ;;  %s2224_s1 = int_to_ptr.vmem [resolvable:$true] %s1261_s1 }
 0x4c4   : > { %s1429_s2 = sshll.u32 %s1258_s0, 7  ;;  %s1618_s27 = scalar_lea.vmem %s2224_s1, 4096 }
 0x4c5   : > { %s2229_s26 = scalar_lea.hbm %s2289_s8, %s1429_s2  ;;  %p1619_p2 = scmp.ne.s32.totalorder %s2224_s1, %s1618_s27 }
 0x4c6   : > { %s1715_s10 = smov [#allocation5]  }
 0x4c7   : > { %p1620_p3 = pnand %p1619_p2, %p1826_p8  ;;  %s1622_s11 = sshll.u32 %s1715_s10, 4  ;;  %s1623_s11 = int_to_ptr.vmem [resolvable:$false] %s1622_s11 }
 0x4c8   : > { %s1624_s15 = scalar_lea.vmem %s1623_s11, 8192  ;;  %p1625_p5 = scmp.lt.s32.totalorder %s2224_s1, %s1623_s11 }
 0x4c9   : > { %p1621_p4 = pneg %p1620_p3  ;;  %p1626_p6 = scmp.lt.s32.totalorder %s1624_s15, %s1618_s27 }
 0x4cb   : > { %p1627_p7 = por %p1626_p6, %p1625_p5 }
 0x4cd   : > { %p1628_p10 = pnand %p1627_p7, %p1621_p4 }
 0x4cf   : > { %1631 = shalt.err (!%p1628_p10)
}
 0x4d0   : > { %s1632_s0 = scalar_lea.hbm %s2229_s26, 4096  ;;  %s1636_s28 = scalar_lea.hbm %s2289_s8, 16384 }
 0x4d1   : > { %p1633_p11 = scmp.ne.s32.totalorder %s2229_s26, %s1632_s0  ;;  %p1637_p0 = scmp.lt.s32.totalorder %s2229_s26, %s2289_s8 }
 0x4d2   : > { %p1638_p1 = scmp.lt.s32.totalorder %s1636_s28, %s1632_s0 }
 0x4d3   : > { %p1634_p12 = pnand %p1633_p11, %p1826_p8 }
 0x4d4   : > { %p1639_p2 = por %p1638_p1, %p1637_p0 }
 0x4d5   : > { %p1635_p13 = pneg %p1634_p12 }
 0x4d7   : > { %p1640_p3 = pnand %p1639_p2, %p1635_p13 }
 0x4d9   : > { %1643 = shalt.err (!%p1640_p3)
}
 0x4da   : > { %s1716_s18 = smov 256   ;;  %s1717_s22 = smov 16  }
 0x4db   : > { %s2301_s24 = scalar_lea.sflag [#allocation6], %s1852_s19 }
 0x4dc   : > { %1444 = dma.vmem_to_hbm [thread:$0]  (%p1826_p8), %s2224_s1, 4096, %s2229_s26, %s2301_s24, %s1716_s18, %s1716_s18, %s1717_s22  }
 0x4dd PF: > { %p1450_p4 = scmp.ge.s32.totalorder %s1710_s14, 2  ;;  %s1283_s27 = sand.u32 1, %s1682_s29  }
 0x4de   : > { %s1284_s10 = scalar_lea.sflag [#allocation6], %s1283_s27 }
 0x4df   : > { %p1447_p5 = pnand %p1450_p4, %p1830_p9 }
 0x4e1   : > { %p1448_p6 = pneg %p1447_p5 }
 0x4e3   : > { %1677 = dma.done.wait (%p1448_p6), %s1284_s10, 4096  }
 0x4e4   : > { %1679 = vsyncadd (%p1448_p6), %s1284_s10, 4294963200  ;;  %s23_s14 = sadd.s32 1, %s1710_s14   ;;  %s2302_s1 = sld [smem:[#allocation8_spill]] }
 0x4e5   : > { %p20_p7 = scmp.ge.s32.totalorder %s23_s14, 6   ;;  %s2303_s29 = smov %s1686_s30 }
 0x4e6   : > { %s2304_s30 = smov %s1690_s9  ;;  %s2305_s9 = smov %s1838_s25 }
 0x4e7   : > { %s2306_s10 = smov %s1702_s12  ;;  %s2307_s11 = smov %s1706_s13 }
 0x4e8   : > { %s2308_s12 = smov %s2311_s16  ;;  %22 = sbr.rel (!%p20_p7) target bundleno = 10 (0xa), region = 179 }
 0x4ea   : > { %s2309_s13 = smov %s2302_s1 }
 0x4ed   :  { %1289 = vsyncpa [#allocation6], 1 }
 0x4ee   :  { %1291 = vsyncpa [#allocation6 + $0x1], 1 }

</bundles_post_ra>
